<compile_context>
chip_gen: v5e
topology: v5e:2x2
jax: 0.10.0
libtpu: 0.0.40
codegen_flags: <defaults>
</compile_context>

<pallas_src>
import jax
import jax.numpy as jnp
from jax.experimental import pallas as pl
from jax.experimental.pallas import tpu as pltpu


D_IN, H1, H2, D_OUT = 4, 50, 50, 1


def pinn_kernel(xt_ref, w1_ref, b1_ref, w2_ref, b2_ref, w3_ref, b3_ref, out_ref):
    # xt_ref : (4, TB)        batch on lanes (lane-dense load)
    # w1_ref : (50, 4)   b1_ref: (50, 1)
    # w2_ref : (50, 50)  b2_ref: (50, 1)
    # w3_ref : (1, 50)   b3_ref: (1, 1)
    # out_ref: (1, TB)        batch on lanes (lane-dense store)
    xt = xt_ref[...]
    h = jnp.dot(w1_ref[...], xt, preferred_element_type=jnp.float32) + b1_ref[...]
    h = jnp.maximum(h, 0.0)                                  # ReLU
    h = jnp.dot(w2_ref[...], h, preferred_element_type=jnp.float32) + b2_ref[...]
    h = jnp.maximum(h, 0.0)                                  # ReLU
    z = jnp.dot(w3_ref[...], h, preferred_element_type=jnp.float32) + b3_ref[...]
    out_ref[...] = 1.0 / (1.0 + jnp.exp(-z))                 # sigmoid


def pinn_forward(x, params, *, block_batch=1024):
    """x: (N, 4) -> (N, 1).  block_batch must be a multiple of 128 (lane width)."""
    w1, b1, w2, b2, w3, b3 = params
    assert block_batch % 128 == 0, "block_batch must be a multiple of 128 lanes"
    N = x.shape[0]
    grid_n = pl.cdiv(N, block_batch)
    n_pad = grid_n * block_batch

    # Lane-dense, transposed, zero-padded input slab: (4, n_pad).
    xt = jnp.zeros((D_IN, n_pad), jnp.float32).at[:, :N].set(x.astype(jnp.float32).T)

    n_weight_elems = w1.size + b1.size + w2.size + b2.size + w3.size + b3.size
    cost = pl.CostEstimate(
        flops=2 * (D_IN * H1 + H1 * H2 + H2 * D_OUT) * n_pad,
        transcendentals=n_pad,                                   # one exp per row
        bytes_accessed=4 * ((D_IN + D_OUT) * n_pad + n_weight_elems),
    )

    out_t = pl.pallas_call(
        pinn_kernel,
        out_shape=jax.ShapeDtypeStruct((D_OUT, n_pad), jnp.float32),
        grid_spec=pltpu.PrefetchScalarGridSpec(
            num_scalar_prefetch=0,
            grid=(grid_n,),
            in_specs=[
                pl.BlockSpec((D_IN, block_batch), lambda i: (0, i)),   # x^T tile
                pl.BlockSpec((H1, D_IN), lambda i: (0, 0)),            # W1 (resident)
                pl.BlockSpec((H1, 1), lambda i: (0, 0)),               # b1
                pl.BlockSpec((H2, H1), lambda i: (0, 0)),              # W2
                pl.BlockSpec((H2, 1), lambda i: (0, 0)),               # b2
                pl.BlockSpec((D_OUT, H2), lambda i: (0, 0)),           # W3
                pl.BlockSpec((D_OUT, 1), lambda i: (0, 0)),            # b3
            ],
            out_specs=pl.BlockSpec((D_OUT, block_batch), lambda i: (0, i)),
        ),
        compiler_params=pltpu.CompilerParams(
            dimension_semantics=("parallel",),
        ),
        cost_estimate=cost,
    )(xt, w1, b1, w2, b2, w3, b3)

    # Drop padding, return PyTorch-shaped (N, 1).
    return out_t[:, :N].T


def init_params(key):
    """PyTorch nn.Linear default init: U(-1/sqrt(fan_in), 1/sqrt(fan_in)); (out, in) layout."""
    ks = jax.random.split(key, 6)
    bd1 = 1.0 / jnp.sqrt(float(D_IN))
    bd2 = 1.0 / jnp.sqrt(float(H1))
    bd3 = 1.0 / jnp.sqrt(float(H2))
    w1 = jax.random.uniform(ks[0], (H1, D_IN), jnp.float32, -bd1, bd1)
    b1 = jax.random.uniform(ks[1], (H1, 1), jnp.float32, -bd1, bd1)
    w2 = jax.random.uniform(ks[2], (H2, H1), jnp.float32, -bd2, bd2)
    b2 = jax.random.uniform(ks[3], (H2, 1), jnp.float32, -bd2, bd2)
    w3 = jax.random.uniform(ks[4], (D_OUT, H2), jnp.float32, -bd3, bd3)
    b3 = jax.random.uniform(ks[5], (D_OUT, 1), jnp.float32, -bd3, bd3)
    # k1..k4 exist on the PyTorch module but do not participate in forward().
    k_consts = jnp.array([0.0015, 0.15, 20.0, 3.5], jnp.float32)
    return (w1, b1, w2, b2, w3, b3), k_consts


def reference(x, params):
    w1, b1, w2, b2, w3, b3 = params
    h = jnp.maximum(x @ w1.T + b1.T, 0.0)
    h = jnp.maximum(h @ w2.T + b2.T, 0.0)
    return jax.nn.sigmoid(h @ w3.T + b3.T)


if __name__ == "__main__":
    key = jax.random.PRNGKey(0)
    kp, kx = jax.random.split(key)
    params, _k = init_params(kp)

    # Small batch of 4-feature inputs, deliberately NOT a multiple of the tile size
    # to exercise the pl.cdiv + padding tail path.
    N = 200
    x = jax.random.uniform(kx, (N, D_IN), jnp.float32, -1.0, 1.0)

    ref = reference(x, params)

    # Default (large) tile: single grid step.
    out_big = jax.block_until_ready(pinn_forward(x, params))
    # Smaller tile: multiple grid steps + ragged tail.
    out_small = jax.block_until_ready(pinn_forward(x, params, block_batch=128))

    assert out_big.shape == (N, 1) and out_small.shape == (N, 1)
    assert jnp.allclose(out_big, ref, rtol=1e-5, atol=1e-5), "mismatch (default tile)"
    assert jnp.allclose(out_small, ref, rtol=1e-5, atol=1e-5), "mismatch (tiled path)"

    print("KERNEL_OK")
</pallas_src>

<mosaic_0001>
module attributes {stable_mosaic.version = 11 : i64} {
  func.func @pinn_kernel(%arg0: i32, %arg1: memref<4x1024xf32, #tpu.memory_space<vmem>>, %arg2: memref<50x4xf32, #tpu.memory_space<vmem>>, %arg3: memref<50x1xf32, #tpu.memory_space<vmem>>, %arg4: memref<50x50xf32, #tpu.memory_space<vmem>>, %arg5: memref<50x1xf32, #tpu.memory_space<vmem>>, %arg6: memref<1x50xf32, #tpu.memory_space<vmem>>, %arg7: memref<1x1xf32, #tpu.memory_space<vmem>>, %arg8: memref<1x1024xf32, #tpu.memory_space<vmem>>) attributes {dimension_semantics = [#tpu.dimension_semantics<parallel>], iteration_bounds = array<i64: 1>, scalar_prefetch = 0 : i64, scratch_operands = 0 : i64, tpu.core_type = #tpu.core_type<tc>, window_params = [{transform_indices = @transform_0, window_bounds = array<i64: 4, 1024>}, {pipeline_mode = #tpu.pipeline_mode<synchronous>, transform_indices = @transform_1, window_bounds = array<i64: 50, 4>}, {pipeline_mode = #tpu.pipeline_mode<synchronous>, transform_indices = @transform_2, window_bounds = array<i64: 50, 1>}, {pipeline_mode = #tpu.pipeline_mode<synchronous>, transform_indices = @transform_3, window_bounds = array<i64: 50, 50>}, {pipeline_mode = #tpu.pipeline_mode<synchronous>, transform_indices = @transform_4, window_bounds = array<i64: 50, 1>}, {pipeline_mode = #tpu.pipeline_mode<synchronous>, transform_indices = @transform_5, window_bounds = array<i64: 1, 50>}, {pipeline_mode = #tpu.pipeline_mode<synchronous>, transform_indices = @transform_6, window_bounds = array<i64: 1, 1>}, {transform_indices = @transform_7, window_bounds = array<i64: 1, 1024>}]} {
    %c0 = arith.constant 0 : index
    %c0_0 = arith.constant 0 : index
    %0 = vector.load %arg1[%c0, %c0_0] : memref<4x1024xf32, #tpu.memory_space<vmem>>, vector<4x1024xf32>
    %c0_1 = arith.constant 0 : index
    %c0_2 = arith.constant 0 : index
    %1 = vector.load %arg2[%c0_1, %c0_2] : memref<50x4xf32, #tpu.memory_space<vmem>>, vector<50x4xf32>
    %cst = arith.constant dense<0.000000e+00> : vector<50x1024xf32>
    %2 = tpu.matmul %1, %0, %cst {dimension_numbers = #tpu.dot_dimension_numbers<[1], [0], [0], [1], [0, 0, 1, 1], [], []>} : vector<50x4xf32>, vector<4x1024xf32>, vector<50x1024xf32> -> vector<50x1024xf32>
    %c0_3 = arith.constant 0 : index
    %c0_4 = arith.constant 0 : index
    %3 = vector.load %arg3[%c0_3, %c0_4] : memref<50x1xf32, #tpu.memory_space<vmem>>, vector<50x1xf32>
    %4 = vector.broadcast %3 : vector<50x1xf32> to vector<50x1024xf32>
    %5 = arith.addf %2, %4 : vector<50x1024xf32>
    %cst_5 = arith.constant 0.000000e+00 : f32
    %6 = vector.broadcast %cst_5 : f32 to vector<50x1024xf32>
    %7 = arith.maximumf %5, %6 : vector<50x1024xf32>
    %c0_6 = arith.constant 0 : index
    %c0_7 = arith.constant 0 : index
    %8 = vector.load %arg4[%c0_6, %c0_7] : memref<50x50xf32, #tpu.memory_space<vmem>>, vector<50x50xf32>
    %cst_8 = arith.constant dense<0.000000e+00> : vector<50x1024xf32>
    %9 = tpu.matmul %8, %7, %cst_8 {dimension_numbers = #tpu.dot_dimension_numbers<[1], [0], [0], [1], [0, 0, 1, 1], [], []>} : vector<50x50xf32>, vector<50x1024xf32>, vector<50x1024xf32> -> vector<50x1024xf32>
    %c0_9 = arith.constant 0 : index
    %c0_10 = arith.constant 0 : index
    %10 = vector.load %arg5[%c0_9, %c0_10] : memref<50x1xf32, #tpu.memory_space<vmem>>, vector<50x1xf32>
    %11 = vector.broadcast %10 : vector<50x1xf32> to vector<50x1024xf32>
    %12 = arith.addf %9, %11 : vector<50x1024xf32>
    %cst_11 = arith.constant 0.000000e+00 : f32
    %13 = vector.broadcast %cst_11 : f32 to vector<50x1024xf32>
    %14 = arith.maximumf %12, %13 : vector<50x1024xf32>
    %c0_12 = arith.constant 0 : index
    %c0_13 = arith.constant 0 : index
    %15 = vector.load %arg6[%c0_12, %c0_13] : memref<1x50xf32, #tpu.memory_space<vmem>>, vector<1x50xf32>
    %cst_14 = arith.constant dense<0.000000e+00> : vector<1x1024xf32>
    %16 = tpu.matmul %15, %14, %cst_14 {dimension_numbers = #tpu.dot_dimension_numbers<[1], [0], [0], [1], [0, 0, 1, 1], [], []>} : vector<1x50xf32>, vector<50x1024xf32>, vector<1x1024xf32> -> vector<1x1024xf32>
    %c0_15 = arith.constant 0 : index
    %c0_16 = arith.constant 0 : index
    %17 = vector.load %arg7[%c0_15, %c0_16] : memref<1x1xf32, #tpu.memory_space<vmem>>, vector<1x1xf32>
    %18 = vector.broadcast %17 : vector<1x1xf32> to vector<1x1024xf32>
    %19 = arith.addf %16, %18 : vector<1x1024xf32>
    %cst_17 = arith.constant 0.000000e+00 : f32
    %20 = vector.broadcast %cst_17 : f32 to vector<1x1024xf32>
    %21 = arith.subf %20, %19 : vector<1x1024xf32>
    %22 = math.exp %21 : vector<1x1024xf32>
    %cst_18 = arith.constant 1.000000e+00 : f32
    %23 = vector.broadcast %cst_18 : f32 to vector<1x1024xf32>
    %24 = arith.addf %23, %22 : vector<1x1024xf32>
    %cst_19 = arith.constant 1.000000e+00 : f32
    %25 = vector.broadcast %cst_19 : f32 to vector<1x1024xf32>
    %26 = arith.divf %25, %24 : vector<1x1024xf32>
    %c0_20 = arith.constant 0 : index
    %c0_21 = arith.constant 0 : index
    %27 = vector.load %arg8[%c0_20, %c0_21] : memref<1x1024xf32, #tpu.memory_space<vmem>>, vector<1x1024xf32>
    tpu.vector_store %arg8[%c0_20, %c0_21], %26 {strides = array<i32>} : memref<1x1024xf32, #tpu.memory_space<vmem>>, vector<1x1024xf32>,
    return
  }
  func.func @transform_0(%arg0: i32) -> (i32, i32) {
    %c0_i32 = arith.constant 0 : i32
    %c0_i32_0 = arith.constant 0 : i32
    return %c0_i32, %arg0 : i32, i32
  }
  func.func @transform_1(%arg0: i32) -> (i32, i32) {
    %c0_i32 = arith.constant 0 : i32
    %c0_i32_0 = arith.constant 0 : i32
    %c0_i32_1 = arith.constant 0 : i32
    return %c0_i32, %c0_i32_0 : i32, i32
  }
  func.func @transform_2(%arg0: i32) -> (i32, i32) {
    %c0_i32 = arith.constant 0 : i32
    %c0_i32_0 = arith.constant 0 : i32
    %c0_i32_1 = arith.constant 0 : i32
    return %c0_i32, %c0_i32_0 : i32, i32
  }
  func.func @transform_3(%arg0: i32) -> (i32, i32) {
    %c0_i32 = arith.constant 0 : i32
    %c0_i32_0 = arith.constant 0 : i32
    %c0_i32_1 = arith.constant 0 : i32
    return %c0_i32, %c0_i32_0 : i32, i32
  }
  func.func @transform_4(%arg0: i32) -> (i32, i32) {
    %c0_i32 = arith.constant 0 : i32
    %c0_i32_0 = arith.constant 0 : i32
    %c0_i32_1 = arith.constant 0 : i32
    return %c0_i32, %c0_i32_0 : i32, i32
  }
  func.func @transform_5(%arg0: i32) -> (i32, i32) {
    %c0_i32 = arith.constant 0 : i32
    %c0_i32_0 = arith.constant 0 : i32
    %c0_i32_1 = arith.constant 0 : i32
    return %c0_i32, %c0_i32_0 : i32, i32
  }
  func.func @transform_6(%arg0: i32) -> (i32, i32) {
    %c0_i32 = arith.constant 0 : i32
    %c0_i32_0 = arith.constant 0 : i32
    %c0_i32_1 = arith.constant 0 : i32
    return %c0_i32, %c0_i32_0 : i32, i32
  }
  func.func @transform_7(%arg0: i32) -> (i32, i32) {
    %c0_i32 = arith.constant 0 : i32
    %c0_i32_0 = arith.constant 0 : i32
    return %c0_i32, %arg0 : i32, i32
  }
}

</mosaic_0001>

<bundles_post_ra>
// kernel: tpu_custom_call.1
= control target key start
LH: loop header
LB: loop body
LE: loop exit
PB: predicated region body
PF: predicated region fallthrough
CT: control target
= control target key end

     0   :  { %s2392_s0 = inlined_call_operand.vmem [shape: f32[4,1024], index: 0, kind: input, shape index: {}]   ;;  %s2393_s1 = inlined_call_operand.vmem [shape: f32[50,4], index: 1, kind: input, shape index: {}]   ;;  %s2394_s2 = inlined_call_operand.vmem [shape: f32[50,1], index: 2, kind: input, shape index: {}]   ;;  %s2395_s3 = inlined_call_operand.vmem [shape: f32[50,50], index: 3, kind: input, shape index: {}]   ;;  %s2396_s4 = inlined_call_operand.vmem [shape: f32[50,1], index: 4, kind: input, shape index: {}]   ;;  %s2397_s5 = inlined_call_operand.vmem [shape: f32[1,50], index: 5, kind: input, shape index: {}]   ;;  %s2398_s6 = inlined_call_operand.<no memory space> [shape: f32[1,1], index: 6, kind: input, shape index: {}]   ;;  %s2399_s7 = inlined_call_operand.hbm [shape: f32[1,1024], index: 7, kind: output, shape index: {}]  }
   0x1   :  { %v12_v0 = vstv %s2398_s6 }
   0x2   :  { %13 = vst [vmem:[#allocation2] sm:$0x1] %v12_v0 }
   0x3   :  { %v29_v1 = vld [vmem:[%s2392_s0] sm:$0xff]  ;;  %v30_v2 = vld [vmem:[%s2392_s0 + $0x8] sm:$0xff]  ;;  %v1555_v3 = vmov 0   ;;  %v46_v4 = vld [vmem:[%s2394_s2 + $0x30] sm:$0x3] }
   0x4   :  { %86 = vst [vmem:[#allocation1] ss:$2 sm:$0xff] %v29_v1  ;;  %1494 = vset.pattern.permute.xlu0 %v1555_v3  ;;  %1495 = vset.pattern.permute.xlu1 %v1555_v3 }
   0x5   :  { %88 = vst [vmem:[#allocation1 + $0x10] ss:$2 sm:$0xff] %v30_v2  ;;  %79 = vperm.xlu0 %1494, %v46_v4   ;;  %1496 = vset.pattern.permute.xlu2 %v1555_v3 }
   0x6   :  { %14 = vsyncpa [#allocation4], 0  ;;  %vm123_vm0 = vcmask 1043456   ;;  %v1612_v5 = vld [vmem:[%s2393_s1] sm:$0xff]  ;;  %vm101_vm1 = vcmask 31744   ;;  %v45_v10 = vld [vmem:[%s2394_s2 + $0x28] sm:$0xff] }
   0x7   :  { %v44_v11 = vld [vmem:[%s2394_s2 + $0x20] sm:$0xff]  ;;  %v1635_v12 = vld [vmem:[%s2393_s1 + $0x8] sm:$0xff]  ;;  %v43_v14 = vld [vmem:[%s2394_s2 + $0x18] sm:$0xff]  ;;  %vm571_vm2 = vcmask 1041408   ;;  %vm549_vm3 = vcmask 408576   ;;  %s1339_s16 = sshll.u32 %s2399_s7, 4  ;;  %s1340_s16 = int_to_ptr.hbm [resolvable:$true] %s1339_s16 }
   0x8   :  { %69 = vperm.xlu1 %1495, %v44_v11   ;;  %v40_v13 = vld [vmem:[%s2394_s2] sm:$0xff]  ;;  %v42_v15 = vld [vmem:[%s2394_s2 + $0x10] sm:$0xff]  ;;  %v32_v16 = vld [vmem:[%s2392_s0 + $0x18] sm:$0xff] }
   0x9   :  { %92 = vst [vmem:[#allocation1 + $0x30] ss:$2 sm:$0xff] %v32_v16  ;;  %59 = vperm.xlu2 %1496, %v42_v15   ;;  %v1660_v17 = vld [vmem:[%s2393_s1 + $0x10] sm:$0xff]  ;;  %v41_v22 = vld [vmem:[%s2394_s2 + $0x8] sm:$0xff]  ;;  %v511_v23 = vld [vmem:[%s2396_s4 + $0x20] sm:$0xff] }
   0xa   :  { %v31_v18 = vld [vmem:[%s2392_s0 + $0x10] sm:$0xff]  ;;  %v36_v24 = vld [vmem:[%s2393_s1 + $0x18] sm:$0xff]  ;;  %v508_v28 = vld [vmem:[%s2396_s4 + $0x8] sm:$0xff] }
   0xb   :  { %v93_v6 = vld.sshfl [vmem:[#allocation1] sm:$0xff pattern:$0x75316420]  ;;  %v94_v7 = vld.sshfl [vmem:[#allocation1 + $0x8] sm:$0xff pattern:$0x75316420] }
   0xc   :  { %1348 = vmatpush.msk.msra.mxu0 %vm123_vm0, %v93_v6  ;;  %1356 = vmatpush.msk.msra.mxu1 %vm123_vm0, %v94_v7  ;;  %v95_v8 = vld.sshfl [vmem:[#allocation1 + $0x10] sm:$0xff pattern:$0x75316420]  ;;  %v96_v9 = vld.sshfl [vmem:[#allocation1 + $0x18] sm:$0xff pattern:$0x75316420] }
   0xd   :  { %1364 = vmatpush.msk.msra.mxu2 %vm123_vm0, %v95_v8  ;;  %1372 = vmatpush.msk.msra.mxu3 %vm123_vm0, %v96_v9  ;;  %90 = vst [vmem:[#allocation1 + $0x20] ss:$2 sm:$0xff] %v31_v18  ;;  %v513_v19 = vld [vmem:[%s2396_s4 + $0x30] sm:$0x3]  ;;  %v510_v27 = vld [vmem:[%s2396_s4 + $0x18] sm:$0xff]  ;;  %v37_v29 = vld [vmem:[%s2393_s1 + $0x20] sm:$0xff] }
   0xe   :  { %1349 = vmatmul.msk.f32.vlgmr.msra.gmra.mxu0 %vm101_vm1, %v1612_v5  ;;  %1357 = vmatmul.msk.f32.vlgmr.msra.gmra.mxu1 %vm101_vm1, %v1612_v5  ;;  %v507_v30 = vld [vmem:[%s2396_s4] sm:$0xff]  ;;  %v38_v31 = vld [vmem:[%s2393_s1 + $0x28] sm:$0xff]  ;;  %v39_v33 = vld [vmem:[%s2393_s1 + $0x30] sm:$0x3] }
   0xf   :  { %1365 = vmatmul.msk.f32.vlgmr.msra.gmra.mxu2 %vm101_vm1, %v1612_v5  ;;  %1373 = vmatmul.msk.f32.vlgmr.msra.gmra.mxu3 %vm101_vm1, %v1612_v5  ;;  %v512_v32 = vld [vmem:[%s2396_s4 + $0x28] sm:$0xff]  ;;  %v509_v34 = vld [vmem:[%s2396_s4 + $0x10] sm:$0xff] }
  0x10   :  { %74 = vperm.xlu0 %1494, %v45_v10   ;;  %64 = vperm.xlu1 %1495, %v43_v14   ;;  %v99_v20 = vld.sshfl [vmem:[#allocation1 + $0x30] sm:$0xff pattern:$0x75316420]  ;;  %v100_v21 = vld.sshfl [vmem:[#allocation1 + $0x38] sm:$0xff pattern:$0x75316420] }
  0x11   :  { %1396 = vmatpush.msk.msrb.mxu2 %vm123_vm0, %v99_v20  ;;  %1404 = vmatpush.msk.msrb.mxu3 %vm123_vm0, %v100_v21  ;;  %v957_v35 = vld [vmem:[#allocation2] sm:$0x1] }
  0x12   :  { %54 = vperm.xlu2 %1496, %v41_v22  }
  0x14   :  { %v97_v25 = vld.sshfl [vmem:[#allocation1 + $0x20] sm:$0xff pattern:$0x75316420]  ;;  %v98_v26 = vld.sshfl [vmem:[#allocation1 + $0x28] sm:$0xff pattern:$0x75316420] }
  0x15   :  { %1380 = vmatpush.msk.msrb.mxu0 %vm123_vm0, %v97_v25  ;;  %1388 = vmatpush.msk.msrb.mxu1 %vm123_vm0, %v98_v26 }
  0x16   :  { %1350 = vmatmul.msk.f32.gmra.mxu0 %vm101_vm1, %v1635_v12  ;;  %1358 = vmatmul.msk.f32.gmra.mxu1 %vm101_vm1, %v1635_v12 }
  0x17   :  { %1366 = vmatmul.msk.f32.gmra.mxu2 %vm101_vm1, %v1635_v12  ;;  %1374 = vmatmul.msk.f32.gmra.mxu3 %vm101_vm1, %v1635_v12 }
  0x18   :  { %49 = vperm.xlu0 %1494, %v40_v13   ;;  %546 = vperm.xlu1 %1495, %v513_v19  }
  0x1a   :  { %541 = vperm.xlu2 %1496, %v512_v32  }
  0x1e   :  { %1351 = vmatmul.msk.f32.gmra.mxu0 %vm101_vm1, %v1660_v17  ;;  %1359 = vmatmul.msk.f32.gmra.mxu1 %vm101_vm1, %v1660_v17 }
  0x1f   :  { %1367 = vmatmul.msk.f32.gmra.mxu2 %vm101_vm1, %v1660_v17  ;;  %1375 = vmatmul.msk.f32.gmra.mxu3 %vm101_vm1, %v1660_v17 }
  0x20   :  { %536 = vperm.xlu0 %1494, %v511_v23   ;;  %531 = vperm.xlu1 %1495, %v510_v27  }
  0x22   :  { %526 = vperm.xlu2 %1496, %v509_v34  }
  0x26   :  { %1352 = vmatmul.msk.f32.gmra.mxu0 %vm101_vm1, %v36_v24  ;;  %1360 = vmatmul.msk.f32.gmra.mxu1 %vm101_vm1, %v36_v24 }
  0x27   :  { %1368 = vmatmul.msk.f32.gmra.mxu2 %vm101_vm1, %v36_v24  ;;  %1376 = vmatmul.msk.f32.gmra.mxu3 %vm101_vm1, %v36_v24 }
  0x28   :  { %521 = vperm.xlu0 %1494, %v508_v28   ;;  %516 = vperm.xlu1 %1495, %v507_v30  }
  0x2a   :  { %960 = vperm.xlu2 %1496, %v957_v35  }
  0x2e   :  { %1353 = vmatmul.msk.f32.gmra.mxu0 %vm101_vm1, %v37_v29  ;;  %1361 = vmatmul.msk.f32.gmra.mxu1 %vm101_vm1, %v37_v29 }
  0x2f   :  { %1369 = vmatmul.msk.f32.gmra.mxu2 %vm101_vm1, %v37_v29  ;;  %1377 = vmatmul.msk.f32.gmra.mxu3 %vm101_vm1, %v37_v29 }
  0x36   :  { %1354 = vmatmul.msk.f32.gmra.mxu0 %vm101_vm1, %v38_v31  ;;  %1362 = vmatmul.msk.f32.gmra.mxu1 %vm101_vm1, %v38_v31 }
  0x37   :  { %1370 = vmatmul.msk.f32.gmra.mxu2 %vm101_vm1, %v38_v31  ;;  %1378 = vmatmul.msk.f32.gmra.mxu3 %vm101_vm1, %v38_v31 }
  0x3e   :  { %1355 = vmatmul.msk.f32.gmra.mxu0 %vm101_vm1, %v39_v33  ;;  %1363 = vmatmul.msk.f32.gmra.mxu1 %vm101_vm1, %v39_v33 }
  0x3f   :  { %1371 = vmatmul.msk.f32.gmra.mxu2 %vm101_vm1, %v39_v33  ;;  %1379 = vmatmul.msk.f32.gmra.mxu3 %vm101_vm1, %v39_v33 }
  0x46   :  { %1381 = vmatmul.msk.f32.vlgmr.msrb.gmra.mxu0 %vm101_vm1, %v1612_v5  ;;  %1389 = vmatmul.msk.f32.vlgmr.msrb.gmra.mxu1 %vm101_vm1, %v1612_v5 }
  0x47   :  { %1397 = vmatmul.msk.f32.vlgmr.msrb.gmra.mxu2 %vm101_vm1, %v1612_v5  ;;  %1405 = vmatmul.msk.f32.vlgmr.msrb.gmra.mxu3 %vm101_vm1, %v1612_v5 }
  0x4e   :  { %1382 = vmatmul.msk.f32.gmra.mxu0 %vm101_vm1, %v1635_v12  ;;  %1390 = vmatmul.msk.f32.gmra.mxu1 %vm101_vm1, %v1635_v12 }
  0x4f   :  { %1398 = vmatmul.msk.f32.gmra.mxu2 %vm101_vm1, %v1635_v12  ;;  %1406 = vmatmul.msk.f32.gmra.mxu3 %vm101_vm1, %v1635_v12 }
  0x56   :  { %1383 = vmatmul.msk.f32.gmra.mxu0 %vm101_vm1, %v1660_v17  ;;  %1391 = vmatmul.msk.f32.gmra.mxu1 %vm101_vm1, %v1660_v17 }
  0x57   :  { %1399 = vmatmul.msk.f32.gmra.mxu2 %vm101_vm1, %v1660_v17  ;;  %1407 = vmatmul.msk.f32.gmra.mxu3 %vm101_vm1, %v1660_v17 }
  0x5e   :  { %1384 = vmatmul.msk.f32.gmra.mxu0 %vm101_vm1, %v36_v24  ;;  %1392 = vmatmul.msk.f32.gmra.mxu1 %vm101_vm1, %v36_v24 }
  0x5f   :  { %1400 = vmatmul.msk.f32.gmra.mxu2 %vm101_vm1, %v36_v24  ;;  %1408 = vmatmul.msk.f32.gmra.mxu3 %vm101_vm1, %v36_v24 }
  0x63   :  { %v1793_v60 = vpop.permute.xlu2 %59 }
  0x66   :  { %1385 = vmatmul.msk.f32.gmra.mxu0 %vm101_vm1, %v37_v29  ;;  %1393 = vmatmul.msk.f32.gmra.mxu1 %vm101_vm1, %v37_v29 }
  0x67   :  { %1401 = vmatmul.msk.f32.gmra.mxu2 %vm101_vm1, %v37_v29  ;;  %1409 = vmatmul.msk.f32.gmra.mxu3 %vm101_vm1, %v37_v29 }
  0x6c   :  { %v1809_v15 = vpop.permute.xlu2 %54 }
  0x6e   :  { %1386 = vmatmul.msk.f32.gmra.mxu0 %vm101_vm1, %v38_v31  ;;  %1394 = vmatmul.msk.f32.gmra.mxu1 %vm101_vm1, %v38_v31 }
  0x6f   :  { %1402 = vmatmul.msk.f32.gmra.mxu2 %vm101_vm1, %v38_v31  ;;  %1410 = vmatmul.msk.f32.gmra.mxu3 %vm101_vm1, %v38_v31 }
  0x76   :  { %1387 = vmatmul.msk.f32.gmra.mxu0 %vm101_vm1, %v39_v33  ;;  %1395 = vmatmul.msk.f32.gmra.mxu1 %vm101_vm1, %v39_v33 }
  0x77   :  { %1403 = vmatmul.msk.f32.gmra.mxu2 %vm101_vm1, %v39_v33  ;;  %1411 = vmatmul.msk.f32.gmra.mxu3 %vm101_vm1, %v39_v33  ;;  %v1789_v54 = vpop.permute.xlu0 %79 }
  0x7a   :  { %v1791_v59 = vpop.permute.xlu1 %69 }
  0x82   :  { %v1795_v61 = vpop.permute.xlu0 %74  ;;  %v1803_v10 = vpop.permute.xlu1 %64 }
  0x8a   :  { %v1823_v32 = vpop.permute.xlu0 %49 }
  0x8b   :  { %v1769_v36 = vpop.f32.mrf.mxu0  ;;  %v1771_v37 = vpop.f32.mrf.mxu1 }
  0x92   :  { %v1773_v38 = vpop.f32.mrf.mxu2  ;;  %v1775_v39 = vpop.f32.mrf.mxu3 }
  0x93   :  { %v160_v40 = vpop.f32.mrf.mxu0  ;;  %v198_v41 = vpop.f32.mrf.mxu1 }
  0x94   :  { %v161_v30 = vadd.f32 %v160_v40, %v1809_v15  ;;  %v199_v31 = vadd.f32 %v198_v41, %v1809_v15  ;;  %v196_v40 = vadd.f32 %v1771_v37, %v1823_v32 }
  0x9a   :  { %v1777_v42 = vpop.f32.mrf.mxu2  ;;  %v1779_v43 = vpop.f32.mrf.mxu3 }
  0x9b   :  { %v163_v44 = vpop.f32.mrf.mxu0  ;;  %v201_v45 = vpop.f32.mrf.mxu1 }
  0x9c   :  { %v164_v16 = vadd.f32 %v163_v44, %v1793_v60  ;;  %v202_v17 = vadd.f32 %v201_v45, %v1793_v60 }
  0x9e   :  { %v460_v45 = vmax.f32 %v164_v16, 0.0  ;;  %v1873_v16 = vld [vmem:[%s2395_s3 + $0x8] sm:$0xff] }
  0xa2   :  { %v1781_v46 = vpop.f32.mrf.mxu2  ;;  %v1783_v47 = vpop.f32.mrf.mxu3 }
  0xa3   :  { %v166_v48 = vpop.f32.mrf.mxu0  ;;  %v204_v49 = vpop.f32.mrf.mxu1  ;;  %v278_v37 = vadd.f32 %v1783_v47, %v1793_v60 }
  0xa4   :  { %v167_v13 = vadd.f32 %v166_v48, %v1803_v10  ;;  %v205_v14 = vadd.f32 %v204_v49, %v1803_v10  ;;  %v461_v48 = vmax.f32 %v202_v17, 0.0  ;;  %v158_v49 = vadd.f32 %v1769_v36, %v1823_v32 }
  0xa5   :  { %v240_v36 = vadd.f32 %v1781_v46, %v1793_v60  ;;  %v275_v46 = vadd.f32 %v1779_v43, %v1809_v15  ;;  %v272_v43 = vadd.f32 %v1775_v39, %v1823_v32 }
  0xa6   :  { %v468_v28 = vmax.f32 %v167_v13, 0.0  ;;  %v469_v29 = vmax.f32 %v205_v14, 0.0 }
  0xaa   :  { %v1785_v50 = vpop.f32.mrf.mxu2  ;;  %v1787_v51 = vpop.f32.mrf.mxu3 }
  0xab   :  { %v169_v52 = vpop.f32.mrf.mxu0  ;;  %v207_v53 = vpop.f32.mrf.mxu1  ;;  %v243_v41 = vadd.f32 %v1785_v50, %v1803_v10 }
  0xac   :  { %v170_v6 = vadd.f32 %v169_v52, %v1791_v59  ;;  %v208_v7 = vadd.f32 %v207_v53, %v1791_v59  ;;  %v281_v52 = vadd.f32 %v1787_v51, %v1803_v10  ;;  %v237_v51 = vadd.f32 %v1777_v42, %v1809_v15  ;;  %v1856_v42 = vld [vmem:[%s2395_s3] sm:$0xff] }
  0xae   :  { %v476_v18 = vmax.f32 %v170_v6, 0.0  ;;  %v477_v19 = vmax.f32 %v208_v7, 0.0  ;;  %v471_v47 = vmax.f32 %v281_v52, 0.0  ;;  %v462_v6 = vmax.f32 %v240_v36, 0.0 }
  0xaf   :  { %v463_v7 = vmax.f32 %v278_v37, 0.0 }
  0xb2   :  { %v245_v55 = vpop.f32.mrf.mxu2  ;;  %v283_v56 = vpop.f32.mrf.mxu3 }
  0xb3   :  { %v172_v57 = vpop.f32.mrf.mxu0  ;;  %v210_v58 = vpop.f32.mrf.mxu1  ;;  %v246_v33 = vadd.f32 %v245_v55, %v1791_v59  ;;  %v284_v34 = vadd.f32 %v283_v56, %v1791_v59  ;;  %v452_v56 = vmax.f32 %v161_v30, 0.0 }
  0xb4   :  { %v173_v2 = vadd.f32 %v172_v57, %v1795_v61  ;;  %v211_v3 = vadd.f32 %v210_v58, %v1795_v61  ;;  %v453_v57 = vmax.f32 %v199_v31, 0.0 }
  0xb5   :  { %v478_v50 = vmax.f32 %v246_v33, 0.0  ;;  %v479_v58 = vmax.f32 %v284_v34, 0.0  ;;  %v1920_v34 = vld [vmem:[%s2395_s3 + $0x20] sm:$0xff] }
  0xb6   :  { %v484_v11 = vmax.f32 %v173_v2, 0.0  ;;  %v485_v12 = vmax.f32 %v211_v3, 0.0  ;;  %v470_v2 = vmax.f32 %v243_v41, 0.0 }
  0xba   :  { %v248_v62 = vpop.f32.mrf.mxu2  ;;  %v286_v63 = vpop.f32.mrf.mxu3 }
  0xbb   :  { %v175_v0 = vpop.f32.mrf.mxu0  ;;  %v213_v1 = vpop.f32.mrf.mxu1  ;;  %v249_v22 = vadd.f32 %v248_v62, %v1795_v61  ;;  %v287_v23 = vadd.f32 %v286_v63, %v1795_v61 }
  0xbc   :  { %v176_v4 = vadd.f32 %v175_v0, %v1789_v54  ;;  %v214_v5 = vadd.f32 %v213_v1, %v1789_v54  ;;  %v444_v0 = vmax.f32 %v158_v49, 0.0  ;;  %v445_v1 = vmax.f32 %v196_v40, 0.0  ;;  %v1934_v40 = vld [vmem:[%s2395_s3 + $0x28] sm:$0xff] }
  0xbd   :  { %v486_v53 = vmax.f32 %v249_v22, 0.0  ;;  %v487_v55 = vmax.f32 %v287_v23, 0.0 }
  0xbe   :  { %v492_v8 = vmax.f32 %v176_v4, 0.0  ;;  %v493_v9 = vmax.f32 %v214_v5, 0.0  ;;  %v234_v5 = vadd.f32 %v1773_v38, %v1823_v32 }
  0xc0   :  { %1412 = vmatpush.msk.msra.mxu0 %vm571_vm2, %v492_v8  ;;  %1420 = vmatpush.msk.msra.mxu1 %vm571_vm2, %v493_v9  ;;  %v454_v8 = vmax.f32 %v237_v51, 0.0  ;;  %v455_v9 = vmax.f32 %v275_v46, 0.0 }
  0xc2   :  { %v251_v20 = vpop.f32.mrf.mxu2  ;;  %v289_v21 = vpop.f32.mrf.mxu3  ;;  %606 = vmatpush.msra.mxu0 %v484_v11  ;;  %644 = vmatpush.msra.mxu1 %v485_v12  ;;  %v446_v11 = vmax.f32 %v234_v5, 0.0  ;;  %v447_v12 = vmax.f32 %v272_v43, 0.0 }
  0xc3   :  { %v252_v24 = vadd.f32 %v251_v20, %v1789_v54  ;;  %v290_v25 = vadd.f32 %v289_v21, %v1789_v54  ;;  %v1817_v26 = vpop.f32.mrf.mxu0  ;;  %v1819_v27 = vpop.f32.mrf.mxu1  ;;  %v1890_v21 = vld [vmem:[%s2395_s3 + $0x10] sm:$0xff] }
  0xc4   :  { %607 = vmatpush.msra.mxu0 %v476_v18  ;;  %645 = vmatpush.msra.mxu1 %v477_v19 }
  0xc5   :  { %v494_v35 = vmax.f32 %v252_v24, 0.0  ;;  %v495_v44 = vmax.f32 %v290_v25, 0.0 }
  0xc6   :  { %608 = vmatpush.msra.mxu0 %v468_v28  ;;  %646 = vmatpush.msra.mxu1 %v469_v29  ;;  %v1907_v28 = vld [vmem:[%s2395_s3 + $0x18] sm:$0xff] }
  0xc7   :  { %1428 = vmatpush.msk.msra.mxu2 %vm571_vm2, %v494_v35  ;;  %1436 = vmatpush.msk.msra.mxu3 %vm571_vm2, %v495_v44 }
  0xc8   :  { %609 = vmatpush.msra.mxu0 %v460_v45  ;;  %647 = vmatpush.msra.mxu1 %v461_v48 }
  0xc9   :  { %682 = vmatpush.msra.mxu2 %v486_v53  ;;  %720 = vmatpush.msra.mxu3 %v487_v55 }
  0xca   :  { %v1843_v62 = vpop.f32.mrf.mxu2  ;;  %v1845_v63 = vpop.f32.mrf.mxu3  ;;  %610 = vmatpush.msra.mxu0 %v452_v56  ;;  %648 = vmatpush.msra.mxu1 %v453_v57 }
  0xcb   :  { %683 = vmatpush.msra.mxu2 %v478_v50  ;;  %721 = vmatpush.msra.mxu3 %v479_v58  ;;  %v1849_v3 = vpop.f32.mrf.mxu0  ;;  %v1851_v4 = vpop.f32.mrf.mxu1 }
  0xcc   :  { %611 = vmatpush.msra.mxu0 %v444_v0  ;;  %649 = vmatpush.msra.mxu1 %v445_v1  ;;  %v313_v0 = vadd.f32 %v1849_v3, %v1809_v15  ;;  %v351_v3 = vadd.f32 %v1851_v4, %v1809_v15 }
  0xcd   :  { %684 = vmatpush.msra.mxu2 %v470_v2  ;;  %722 = vmatpush.msra.mxu3 %v471_v47 }
  0xce   :  { %1413 = vmatmul.msk.f32.vlgmr.msra.gmra.mxu0 %vm549_vm3, %v1856_v42  ;;  %1421 = vmatmul.msk.f32.vlgmr.msra.gmra.mxu1 %vm549_vm3, %v1856_v42 }
  0xcf   :  { %685 = vmatpush.msra.mxu2 %v462_v6  ;;  %723 = vmatpush.msra.mxu3 %v463_v7 }
  0xd1   :  { %686 = vmatpush.msra.mxu2 %v454_v8  ;;  %724 = vmatpush.msra.mxu3 %v455_v9  ;;  %v1962_v8 = vld [vmem:[%s2395_s3 + $0x30] sm:$0x3] }
  0xd2   :  { %v1866_v38 = vpop.f32.mrf.mxu2  ;;  %v1868_v39 = vpop.f32.mrf.mxu3 }
  0xd3   :  { %687 = vmatpush.msra.mxu2 %v446_v11  ;;  %725 = vmatpush.msra.mxu3 %v447_v12  ;;  %v315_v13 = vpop.f32.mrf.mxu0  ;;  %v353_v14 = vpop.f32.mrf.mxu1 }
  0xd4   :  { %1429 = vmatmul.msk.f32.vlgmr.msra.gmra.mxu2 %vm549_vm3, %v1856_v42  ;;  %1437 = vmatmul.msk.f32.vlgmr.msra.gmra.mxu3 %vm549_vm3, %v1856_v42  ;;  %v316_v1 = vadd.f32 %v315_v13, %v1793_v60  ;;  %v354_v46 = vadd.f32 %v353_v14, %v1793_v60 }
  0xd6   :  { %1414 = vmatmul.msk.f32.gmra.mxu0 %vm549_vm3, %v1873_v16  ;;  %1422 = vmatmul.msk.f32.gmra.mxu1 %vm549_vm3, %v1873_v16 }
  0xda   :  { %v1883_v17 = vpop.f32.mrf.mxu2  ;;  %v1885_v18 = vpop.f32.mrf.mxu3 }
  0xdb   :  { %v318_v19 = vpop.f32.mrf.mxu0  ;;  %v356_v20 = vpop.f32.mrf.mxu1 }
  0xdc   :  { %1430 = vmatmul.msk.f32.gmra.mxu2 %vm549_vm3, %v1873_v16  ;;  %1438 = vmatmul.msk.f32.gmra.mxu3 %vm549_vm3, %v1873_v16  ;;  %v319_v58 = vadd.f32 %v318_v19, %v1803_v10  ;;  %v357_v51 = vadd.f32 %v356_v20, %v1803_v10  ;;  %v465_v20 = vmax.f32 %v354_v46, 0.0 }
  0xde   :  { %1415 = vmatmul.msk.f32.gmra.mxu0 %vm549_vm3, %v1890_v21  ;;  %1423 = vmatmul.msk.f32.gmra.mxu1 %vm549_vm3, %v1890_v21  ;;  %v472_v12 = vmax.f32 %v319_v58, 0.0 }
  0xe2   :  { %v1900_v22 = vpop.f32.mrf.mxu2  ;;  %v1902_v23 = vpop.f32.mrf.mxu3 }
  0xe3   :  { %v321_v24 = vpop.f32.mrf.mxu0  ;;  %v359_v25 = vpop.f32.mrf.mxu1 }
  0xe4   :  { %1431 = vmatmul.msk.f32.gmra.mxu2 %vm549_vm3, %v1890_v21  ;;  %1439 = vmatmul.msk.f32.gmra.mxu3 %vm549_vm3, %v1890_v21  ;;  %v322_v57 = vadd.f32 %v321_v24, %v1791_v59  ;;  %v360_v36 = vadd.f32 %v359_v25, %v1791_v59  ;;  %v310_v24 = vadd.f32 %v1817_v26, %v1823_v32 }
  0xe5   :  { %v348_v25 = vadd.f32 %v1819_v27, %v1823_v32  ;;  %v392_v27 = vadd.f32 %v1883_v17, %v1793_v60  ;;  %v424_v17 = vadd.f32 %v1845_v63, %v1823_v32 }
  0xe6   :  { %1416 = vmatmul.msk.f32.gmra.mxu0 %vm549_vm3, %v1907_v28  ;;  %1424 = vmatmul.msk.f32.gmra.mxu1 %vm549_vm3, %v1907_v28  ;;  %v480_v5 = vmax.f32 %v322_v57, 0.0  ;;  %v481_v43 = vmax.f32 %v360_v36, 0.0 }
  0xea   :  { %v397_v29 = vpop.f32.mrf.mxu2  ;;  %v435_v30 = vpop.f32.mrf.mxu3 }
  0xeb   :  { %v324_v31 = vpop.f32.mrf.mxu0  ;;  %v362_v33 = vpop.f32.mrf.mxu1  ;;  %v398_v19 = vadd.f32 %v397_v29, %v1791_v59  ;;  %v436_v4 = vadd.f32 %v435_v30, %v1791_v59  ;;  %v456_v59 = vmax.f32 %v313_v0, 0.0  ;;  %v457_v30 = vmax.f32 %v351_v3, 0.0 }
  0xec   :  { %1432 = vmatmul.msk.f32.gmra.mxu2 %vm549_vm3, %v1907_v28  ;;  %1440 = vmatmul.msk.f32.gmra.mxu3 %vm549_vm3, %v1907_v28  ;;  %v325_v45 = vadd.f32 %v324_v31, %v1795_v61  ;;  %v363_v41 = vadd.f32 %v362_v33, %v1795_v61  ;;  %v395_v33 = vadd.f32 %v1900_v22, %v1803_v10 }
  0xed   :  { %v482_v26 = vmax.f32 %v398_v19, 0.0  ;;  %v427_v22 = vadd.f32 %v1868_v39, %v1809_v15 }
  0xee   :  { %1417 = vmatmul.msk.f32.gmra.mxu0 %vm549_vm3, %v1920_v34  ;;  %1425 = vmatmul.msk.f32.gmra.mxu1 %vm549_vm3, %v1920_v34  ;;  %v488_v37 = vmax.f32 %v325_v45, 0.0  ;;  %v489_v50 = vmax.f32 %v363_v41, 0.0  ;;  %v430_v45 = vadd.f32 %v1885_v18, %v1793_v60  ;;  %v386_v60 = vadd.f32 %v1843_v62, %v1823_v32 }
  0xef   :  { %v459_v39 = vmax.f32 %v427_v22, 0.0 }
  0xf0   :  { %v467_v18 = vmax.f32 %v430_v45, 0.0 }
  0xf2   :  { %v400_v35 = vpop.f32.mrf.mxu2  ;;  %v438_v44 = vpop.f32.mrf.mxu3 }
  0xf3   :  { %v327_v48 = vpop.f32.mrf.mxu0  ;;  %v365_v49 = vpop.f32.mrf.mxu1  ;;  %v401_v9 = vadd.f32 %v400_v35, %v1795_v61  ;;  %v439_v11 = vadd.f32 %v438_v44, %v1795_v61  ;;  %v464_v61 = vmax.f32 %v316_v1, 0.0  ;;  %v433_v35 = vadd.f32 %v1902_v23, %v1803_v10 }
  0xf4   :  { %v328_v52 = vadd.f32 %v327_v48, %v1789_v54  ;;  %v366_v53 = vadd.f32 %v365_v49, %v1789_v54  ;;  %1433 = vmatmul.msk.f32.gmra.mxu2 %vm549_vm3, %v1920_v34  ;;  %1441 = vmatmul.msk.f32.gmra.mxu3 %vm549_vm3, %v1920_v34  ;;  %v483_v44 = vmax.f32 %v436_v4, 0.0  ;;  %v448_v48 = vmax.f32 %v310_v24, 0.0  ;;  %v2076_v1 = vpop.permute.xlu1 %546 }
  0xf5   :  { %v490_v31 = vmax.f32 %v401_v9, 0.0  ;;  %v491_v29 = vmax.f32 %v439_v11, 0.0  ;;  %v449_v49 = vmax.f32 %v348_v25, 0.0  ;;  %v389_v10 = vadd.f32 %v1866_v38, %v1809_v15 }
  0xf6   :  { %v496_v55 = vmax.f32 %v328_v52, 0.0  ;;  %v497_v56 = vmax.f32 %v366_v53, 0.0  ;;  %1418 = vmatmul.msk.f32.gmra.mxu0 %vm549_vm3, %v1934_v40  ;;  %1426 = vmatmul.msk.f32.gmra.mxu1 %vm549_vm3, %v1934_v40  ;;  %v474_v23 = vmax.f32 %v395_v33, 0.0  ;;  %v475_v41 = vmax.f32 %v433_v35, 0.0 }
  0xf7   :  { %v466_v38 = vmax.f32 %v392_v27, 0.0  ;;  %v458_v15 = vmax.f32 %v389_v10, 0.0  ;;  %v450_v52 = vmax.f32 %v386_v60, 0.0  ;;  %v451_v53 = vmax.f32 %v424_v17, 0.0 }
  0xf8   :  { %1444 = vmatpush.msk.msrb.mxu0 %vm571_vm2, %v496_v55  ;;  %1452 = vmatpush.msk.msrb.mxu1 %vm571_vm2, %v497_v56 }
  0xfa   :  { %v403_v2 = vpop.f32.mrf.mxu2  ;;  %v441_v47 = vpop.f32.mrf.mxu3  ;;  %758 = vmatpush.msrb.mxu0 %v488_v37  ;;  %796 = vmatpush.msrb.mxu1 %v489_v50 }
  0xfb   :  { %v404_v6 = vadd.f32 %v403_v2, %v1789_v54  ;;  %v442_v7 = vadd.f32 %v441_v47, %v1789_v54  ;;  %v473_v54 = vmax.f32 %v357_v51, 0.0  ;;  %v2078_v47 = vpop.permute.xlu2 %541 }
  0xfc   :  { %1434 = vmatmul.msk.f32.gmra.mxu2 %vm549_vm3, %v1934_v40  ;;  %1442 = vmatmul.msk.f32.gmra.mxu3 %vm549_vm3, %v1934_v40 }
  0xfd   :  { %v498_v13 = vmax.f32 %v404_v6, 0.0  ;;  %v499_v14 = vmax.f32 %v442_v7, 0.0  ;;  %759 = vmatpush.msrb.mxu0 %v480_v5  ;;  %797 = vmatpush.msrb.mxu1 %v481_v43  ;;  %v2080_v6 = vpop.permute.xlu0 %536  ;;  %v2082_v7 = vpop.permute.xlu1 %531 }
  0xfe   :  { %1419 = vmatmul.msk.f32.gmra.mxu0 %vm549_vm3, %v1962_v8  ;;  %1427 = vmatmul.msk.f32.gmra.mxu1 %vm549_vm3, %v1962_v8 }
  0xff   :  { %760 = vmatpush.msrb.mxu0 %v472_v12  ;;  %798 = vmatpush.msrb.mxu1 %v473_v54 }
 0x100   :  { %1460 = vmatpush.msk.msrb.mxu2 %vm571_vm2, %v498_v13  ;;  %1468 = vmatpush.msk.msrb.mxu3 %vm571_vm2, %v499_v14 }
 0x101   :  { %761 = vmatpush.msrb.mxu0 %v464_v61  ;;  %799 = vmatpush.msrb.mxu1 %v465_v20 }
 0x102   :  { %834 = vmatpush.msrb.mxu2 %v490_v31  ;;  %872 = vmatpush.msrb.mxu3 %v491_v29 }
 0x103   :  { %762 = vmatpush.msrb.mxu0 %v456_v59  ;;  %800 = vmatpush.msrb.mxu1 %v457_v30  ;;  %v2094_v59 = vpop.permute.xlu2 %526 }
 0x104   :  { %835 = vmatpush.msrb.mxu2 %v482_v26  ;;  %873 = vmatpush.msrb.mxu3 %v483_v44 }
 0x105   :  { %1435 = vmatmul.msk.f32.gmra.mxu2 %vm549_vm3, %v1962_v8  ;;  %1443 = vmatmul.msk.f32.gmra.mxu3 %vm549_vm3, %v1962_v8  ;;  %v2098_v44 = vpop.permute.xlu0 %521  ;;  %v2100_v27 = vpop.permute.xlu1 %516 }
 0x106   :  { %763 = vmatpush.msrb.mxu0 %v448_v48  ;;  %801 = vmatpush.msrb.mxu1 %v449_v49 }
 0x107   :  { %836 = vmatpush.msrb.mxu2 %v474_v23  ;;  %874 = vmatpush.msrb.mxu3 %v475_v41 }
 0x108   :  { %1445 = vmatmul.msk.f32.vlgmr.msrb.gmra.mxu0 %vm549_vm3, %v1856_v42  ;;  %1453 = vmatmul.msk.f32.vlgmr.msrb.gmra.mxu1 %vm549_vm3, %v1856_v42 }
 0x109   :  { %837 = vmatpush.msrb.mxu2 %v466_v38  ;;  %875 = vmatpush.msrb.mxu3 %v467_v18 }
 0x10b   :  { %838 = vmatpush.msrb.mxu2 %v458_v15  ;;  %876 = vmatpush.msrb.mxu3 %v459_v39 }
 0x10d   :  { %839 = vmatpush.msrb.mxu2 %v450_v52  ;;  %877 = vmatpush.msrb.mxu3 %v451_v53 }
 0x10e   :  { %1461 = vmatmul.msk.f32.vlgmr.msrb.gmra.mxu2 %vm549_vm3, %v1856_v42  ;;  %1469 = vmatmul.msk.f32.vlgmr.msrb.gmra.mxu3 %vm549_vm3, %v1856_v42 }
 0x110   :  { %1446 = vmatmul.msk.f32.gmra.mxu0 %vm549_vm3, %v1873_v16  ;;  %1454 = vmatmul.msk.f32.gmra.mxu1 %vm549_vm3, %v1873_v16 }
 0x116   :  { %1462 = vmatmul.msk.f32.gmra.mxu2 %vm549_vm3, %v1873_v16  ;;  %1470 = vmatmul.msk.f32.gmra.mxu3 %vm549_vm3, %v1873_v16 }
 0x118   :  { %1447 = vmatmul.msk.f32.gmra.mxu0 %vm549_vm3, %v1890_v21  ;;  %1455 = vmatmul.msk.f32.gmra.mxu1 %vm549_vm3, %v1890_v21 }
 0x11e   :  { %1463 = vmatmul.msk.f32.gmra.mxu2 %vm549_vm3, %v1890_v21  ;;  %1471 = vmatmul.msk.f32.gmra.mxu3 %vm549_vm3, %v1890_v21 }
 0x120   :  { %1448 = vmatmul.msk.f32.gmra.mxu0 %vm549_vm3, %v1907_v28  ;;  %1456 = vmatmul.msk.f32.gmra.mxu1 %vm549_vm3, %v1907_v28 }
 0x126   :  { %1464 = vmatmul.msk.f32.gmra.mxu2 %vm549_vm3, %v1907_v28  ;;  %1472 = vmatmul.msk.f32.gmra.mxu3 %vm549_vm3, %v1907_v28 }
 0x128   :  { %1449 = vmatmul.msk.f32.gmra.mxu0 %vm549_vm3, %v1920_v34  ;;  %1457 = vmatmul.msk.f32.gmra.mxu1 %vm549_vm3, %v1920_v34 }
 0x12e   :  { %1465 = vmatmul.msk.f32.gmra.mxu2 %vm549_vm3, %v1920_v34  ;;  %1473 = vmatmul.msk.f32.gmra.mxu3 %vm549_vm3, %v1920_v34 }
 0x130   :  { %1450 = vmatmul.msk.f32.gmra.mxu0 %vm549_vm3, %v1934_v40  ;;  %1458 = vmatmul.msk.f32.gmra.mxu1 %vm549_vm3, %v1934_v40 }
 0x136   :  { %1466 = vmatmul.msk.f32.gmra.mxu2 %vm549_vm3, %v1934_v40  ;;  %1474 = vmatmul.msk.f32.gmra.mxu3 %vm549_vm3, %v1934_v40 }
 0x138   :  { %1451 = vmatmul.msk.f32.gmra.mxu0 %vm549_vm3, %v1962_v8  ;;  %1459 = vmatmul.msk.f32.gmra.mxu1 %vm549_vm3, %v1962_v8 }
 0x13e   :  { %1467 = vmatmul.msk.f32.gmra.mxu2 %vm549_vm3, %v1962_v8  ;;  %1475 = vmatmul.msk.f32.gmra.mxu3 %vm549_vm3, %v1962_v8 }
 0x14b   :  { %v613_v32 = vpop.f32.mrf.mxu0  ;;  %v651_v62 = vpop.f32.mrf.mxu1 }
 0x14c   :  { %v614_v41 = vadd.f32 %v613_v32, %v2100_v27  ;;  %v652_v60 = vadd.f32 %v651_v62, %v2100_v27 }
 0x14e   :  { %v901_v62 = vmax.f32 %v652_v60, 0.0 }
 0x153   :  { %v616_v63 = vpop.f32.mrf.mxu0  ;;  %v654_v42 = vpop.f32.mrf.mxu1 }
 0x154   :  { %v617_v45 = vadd.f32 %v616_v63, %v2098_v44  ;;  %v655_v48 = vadd.f32 %v654_v42, %v2098_v44 }
 0x156   :  { %v908_v18 = vmax.f32 %v617_v45, 0.0  ;;  %v909_v15 = vmax.f32 %v655_v48, 0.0 }
 0x157   :  { %v2060_v16 = vpop.f32.mrf.mxu2  ;;  %v2062_v21 = vpop.f32.mrf.mxu3 }
 0x15b   :  { %v619_v28 = vpop.f32.mrf.mxu0  ;;  %v657_v34 = vpop.f32.mrf.mxu1 }
 0x15c   :  { %v620_v30 = vadd.f32 %v619_v28, %v2094_v59  ;;  %v658_v33 = vadd.f32 %v657_v34, %v2094_v59  ;;  %v900_v28 = vmax.f32 %v614_v41, 0.0 }
 0x15e   :  { %v916_v17 = vmax.f32 %v620_v30, 0.0  ;;  %v917_v38 = vmax.f32 %v658_v33, 0.0 }
 0x15f   :  { %v2064_v40 = vpop.f32.mrf.mxu2  ;;  %v2066_v55 = vpop.f32.mrf.mxu3 }
 0x163   :  { %v622_v56 = vpop.f32.mrf.mxu0  ;;  %v660_v57 = vpop.f32.mrf.mxu1 }
 0x164   :  { %v623_v24 = vadd.f32 %v622_v56, %v2082_v7  ;;  %v661_v25 = vadd.f32 %v660_v57, %v2082_v7 }
 0x166   :  { %v924_v49 = vmax.f32 %v623_v24, 0.0  ;;  %v925_v10 = vmax.f32 %v661_v25, 0.0 }
 0x167   :  { %v2068_v36 = vpop.f32.mrf.mxu2  ;;  %v2070_v37 = vpop.f32.mrf.mxu3 }
 0x16b   :  { %v625_v50 = vpop.f32.mrf.mxu0  ;;  %v663_v58 = vpop.f32.mrf.mxu1 }
 0x16c   :  { %v626_v13 = vadd.f32 %v625_v50, %v2080_v6  ;;  %v664_v14 = vadd.f32 %v663_v58, %v2080_v6  ;;  %v2119_v58 = vld [vmem:[%s2397_s5] sm:$0x1]  ;;  %s1556_s5 = smov [#allocation3]  }
 0x16d   :  { %s1337_s13 = sshll.u32 %s1556_s5, 4  ;;  %s1338_s13 = int_to_ptr.vmem [resolvable:$true] %s1337_s13 }
 0x16e   :  { %v932_v35 = vmax.f32 %v626_v13, 0.0  ;;  %v933_v26 = vmax.f32 %v664_v14, 0.0 }
 0x16f   :  { %v2072_v51 = vpop.f32.mrf.mxu2  ;;  %v2074_v0 = vpop.f32.mrf.mxu3 }
 0x173   :  { %v628_v46 = vpop.f32.mrf.mxu0  ;;  %v666_v2 = vpop.f32.mrf.mxu1 }
 0x174   :  { %v629_v9 = vadd.f32 %v628_v46, %v2078_v47  ;;  %v667_v11 = vadd.f32 %v666_v2, %v2078_v47  ;;  %v699_v46 = vadd.f32 %v2072_v51, %v2082_v7  ;;  %v737_v2 = vadd.f32 %v2074_v0, %v2082_v7 }
 0x175   :  { %v696_v51 = vadd.f32 %v2068_v36, %v2094_v59  ;;  %v734_v0 = vadd.f32 %v2070_v37, %v2094_v59  ;;  %v690_v36 = vadd.f32 %v2060_v16, %v2100_v27  ;;  %v728_v37 = vadd.f32 %v2062_v21, %v2100_v27 }
 0x176   :  { %v940_v31 = vmax.f32 %v629_v9, 0.0  ;;  %v941_v29 = vmax.f32 %v667_v11, 0.0  ;;  %v926_v13 = vmax.f32 %v699_v46, 0.0  ;;  %v927_v14 = vmax.f32 %v737_v2, 0.0 }
 0x177   :  { %v701_v5 = vpop.f32.mrf.mxu2  ;;  %v739_v43 = vpop.f32.mrf.mxu3 }
 0x178   :  { %v702_v34 = vadd.f32 %v701_v5, %v2080_v6  ;;  %v740_v56 = vadd.f32 %v739_v43, %v2080_v6 }
 0x17a   :  { %v934_v9 = vmax.f32 %v702_v34, 0.0  ;;  %v935_v11 = vmax.f32 %v740_v56, 0.0 }
 0x17b   :  { %v631_v8 = vpop.f32.mrf.mxu0  ;;  %v669_v3 = vpop.f32.mrf.mxu1 }
 0x17c   :  { %v632_v12 = vadd.f32 %v631_v8, %v2076_v1  ;;  %v670_v54 = vadd.f32 %v669_v3, %v2076_v1 }
 0x17e   :  { %v948_v19 = vmax.f32 %v632_v12, 0.0  ;;  %v949_v4 = vmax.f32 %v670_v54, 0.0  ;;  %v693_v12 = vadd.f32 %v2064_v40, %v2098_v44  ;;  %v731_v54 = vadd.f32 %v2066_v55, %v2098_v44 }
 0x17f   :  { %v704_v61 = vpop.f32.mrf.mxu2  ;;  %v742_v20 = vpop.f32.mrf.mxu3 }
 0x180   :  { %1476 = vmatpush.msk.msra.mxu0 %vm571_vm2, %v948_v19  ;;  %1478 = vmatpush.msk.msra.mxu1 %vm571_vm2, %v949_v4  ;;  %v705_v53 = vadd.f32 %v704_v61, %v2078_v47  ;;  %v743_v63 = vadd.f32 %v742_v20, %v2078_v47  ;;  %v918_v61 = vmax.f32 %v696_v51, 0.0  ;;  %v919_v20 = vmax.f32 %v734_v0, 0.0 }
 0x181   :  { %v910_v40 = vmax.f32 %v693_v12, 0.0  ;;  %v911_v55 = vmax.f32 %v731_v54, 0.0 }
 0x182   :  { %1001 = vmatpush.msra.mxu0 %v940_v31  ;;  %1021 = vmatpush.msra.mxu1 %v941_v29  ;;  %v942_v8 = vmax.f32 %v705_v53, 0.0  ;;  %v943_v3 = vmax.f32 %v743_v63, 0.0  ;;  %v902_v31 = vmax.f32 %v690_v36, 0.0  ;;  %v903_v29 = vmax.f32 %v728_v37, 0.0 }
 0x184   :  { %1002 = vmatpush.msra.mxu0 %v932_v35  ;;  %1022 = vmatpush.msra.mxu1 %v933_v26 }
 0x185   :  { %v2104_v22 = vpop.f32.mrf.mxu0  ;;  %v2106_v23 = vpop.f32.mrf.mxu1 }
 0x186   :  { %1003 = vmatpush.msra.mxu0 %v924_v49  ;;  %1023 = vmatpush.msra.mxu1 %v925_v10 }
 0x188   :  { %v707_v39 = vpop.f32.mrf.mxu2  ;;  %v745_v52 = vpop.f32.mrf.mxu3  ;;  %1004 = vmatpush.msra.mxu0 %v916_v17  ;;  %1024 = vmatpush.msra.mxu1 %v917_v38 }
 0x189   :  { %v708_v42 = vadd.f32 %v707_v39, %v2076_v1  ;;  %v746_v32 = vadd.f32 %v745_v52, %v2076_v1 }
 0x18a   :  { %1005 = vmatpush.msra.mxu0 %v908_v18  ;;  %1025 = vmatpush.msra.mxu1 %v909_v15 }
 0x18b   :  { %v950_v57 = vmax.f32 %v708_v42, 0.0  ;;  %v951_v50 = vmax.f32 %v746_v32, 0.0 }
 0x18c   :  { %1006 = vmatpush.msra.mxu0 %v900_v28  ;;  %1026 = vmatpush.msra.mxu1 %v901_v62 }
 0x18d   :  { %v2125_v5 = vpop.f32.mrf.mxu0  ;;  %v2127_v43 = vpop.f32.mrf.mxu1  ;;  %1480 = vmatpush.msk.msra.mxu2 %vm571_vm2, %v950_v57  ;;  %1482 = vmatpush.msk.msra.mxu3 %vm571_vm2, %v951_v50 }
 0x18e   :  { %1477 = vmatmul.msk.f32.vlgmr.msra.gmra.mxu0 %vm549_vm3, %v2119_v58  ;;  %1479 = vmatmul.msk.f32.vlgmr.msra.gmra.mxu1 %vm549_vm3, %v2119_v58 }
 0x18f   :  { %1041 = vmatpush.msra.mxu2 %v942_v8  ;;  %1061 = vmatpush.msra.mxu3 %v943_v3 }
 0x191   :  { %v2143_v19 = vpop.f32.mrf.mxu2  ;;  %v2145_v4 = vpop.f32.mrf.mxu3  ;;  %1042 = vmatpush.msra.mxu2 %v934_v9  ;;  %1062 = vmatpush.msra.mxu3 %v935_v11  ;;  %v769_v9 = vadd.f32 %v2125_v5, %v2098_v44  ;;  %v807_v11 = vadd.f32 %v2127_v43, %v2098_v44 }
 0x193   :  { %1043 = vmatpush.msra.mxu2 %v926_v13  ;;  %1063 = vmatpush.msra.mxu3 %v927_v14  ;;  %v766_v13 = vadd.f32 %v2104_v22, %v2100_v27  ;;  %v804_v14 = vadd.f32 %v2106_v23, %v2100_v27  ;;  %v912_v5 = vmax.f32 %v769_v9, 0.0 }
 0x195   :  { %v771_v24 = vpop.f32.mrf.mxu0  ;;  %v809_v25 = vpop.f32.mrf.mxu1  ;;  %1044 = vmatpush.msra.mxu2 %v918_v61  ;;  %1064 = vmatpush.msra.mxu3 %v919_v20  ;;  %v905_v23 = vmax.f32 %v804_v14, 0.0 }
 0x196   :  { %v772_v8 = vadd.f32 %v771_v24, %v2094_v59  ;;  %v810_v3 = vadd.f32 %v809_v25, %v2094_v59  ;;  %v904_v25 = vmax.f32 %v766_v13, 0.0 }
 0x197   :  { %1045 = vmatpush.msra.mxu2 %v910_v40  ;;  %1065 = vmatpush.msra.mxu3 %v911_v55  ;;  %v913_v40 = vmax.f32 %v807_v11, 0.0 }
 0x198   :  { %v920_v36 = vmax.f32 %v772_v8, 0.0  ;;  %v921_v37 = vmax.f32 %v810_v3, 0.0 }
 0x199   :  { %v2151_v30 = vpop.f32.mrf.mxu2  ;;  %v2153_v16 = vpop.f32.mrf.mxu3  ;;  %1046 = vmatpush.msra.mxu2 %v902_v31  ;;  %1066 = vmatpush.msra.mxu3 %v903_v29 }
 0x19a   :  { %1481 = vmatmul.msk.f32.vlgmr.msra.gmra.mxu2 %vm549_vm3, %v2119_v58  ;;  %1483 = vmatmul.msk.f32.vlgmr.msra.gmra.mxu3 %vm549_vm3, %v2119_v58 }
 0x19d   :  { %v774_v21 = vpop.f32.mrf.mxu0  ;;  %v812_v33 = vpop.f32.mrf.mxu1 }
 0x19e   :  { %v775_v57 = vadd.f32 %v774_v21, %v2082_v7  ;;  %v813_v50 = vadd.f32 %v812_v33, %v2082_v7 }
 0x1a0   :  { %v928_v12 = vmax.f32 %v775_v57, 0.0  ;;  %v929_v54 = vmax.f32 %v813_v50, 0.0 }
 0x1a1   :  { %v2159_v35 = vpop.f32.mrf.mxu2  ;;  %v2161_v26 = vpop.f32.mrf.mxu3 }
 0x1a5   :  { %v777_v45 = vpop.f32.mrf.mxu0  ;;  %v815_v48 = vpop.f32.mrf.mxu1 }
 0x1a6   :  { %v778_v42 = vadd.f32 %v777_v45, %v2080_v6  ;;  %v816_v32 = vadd.f32 %v815_v48, %v2080_v6 }
 0x1a8   :  { %v936_v51 = vmax.f32 %v778_v42, 0.0  ;;  %v937_v0 = vmax.f32 %v816_v32, 0.0 }
 0x1a9   :  { %v850_v49 = vpop.f32.mrf.mxu2  ;;  %v888_v10 = vpop.f32.mrf.mxu3 }
 0x1aa   :  { %v889_v45 = vadd.f32 %v888_v10, %v2082_v7  ;;  %v845_v10 = vadd.f32 %v2151_v30, %v2098_v44 }
 0x1ad   :  { %v780_v41 = vpop.f32.mrf.mxu0  ;;  %v818_v60 = vpop.f32.mrf.mxu1 }
 0x1ae   :  { %v781_v39 = vadd.f32 %v780_v41, %v2078_v47  ;;  %v819_v52 = vadd.f32 %v818_v60, %v2078_v47  ;;  %v883_v60 = vadd.f32 %v2153_v16, %v2098_v44 }
 0x1b0   :  { %v944_v46 = vmax.f32 %v781_v39, 0.0  ;;  %v945_v2 = vmax.f32 %v819_v52, 0.0  ;;  %v915_v39 = vmax.f32 %v883_v60, 0.0 }
 0x1b1   :  { %v853_v17 = vpop.f32.mrf.mxu2  ;;  %v891_v38 = vpop.f32.mrf.mxu3 }
 0x1b2   :  { %v854_v21 = vadd.f32 %v853_v17, %v2080_v6  ;;  %v892_v33 = vadd.f32 %v891_v38, %v2080_v6  ;;  %v886_v6 = vadd.f32 %v2161_v26, %v2094_v59  ;;  %v931_v38 = vmax.f32 %v889_v45, 0.0 }
 0x1b5   :  { %v783_v18 = vpop.f32.mrf.mxu0  ;;  %v821_v15 = vpop.f32.mrf.mxu1 }
 0x1b6   :  { %v784_v53 = vadd.f32 %v783_v18, %v2076_v1  ;;  %v822_v63 = vadd.f32 %v821_v15, %v2076_v1  ;;  %v923_v18 = vmax.f32 %v886_v6, 0.0  ;;  %v914_v15 = vmax.f32 %v845_v10, 0.0 }
 0x1b8   :  { %v952_v28 = vmax.f32 %v784_v53, 0.0  ;;  %v953_v62 = vmax.f32 %v822_v63, 0.0 }
 0x1b9   :  { %v856_v34 = vpop.f32.mrf.mxu2  ;;  %v894_v56 = vpop.f32.mrf.mxu3 }
 0x1ba   :  { %1484 = vmatpush.msk.msrb.mxu0 %vm571_vm2, %v952_v28  ;;  %1486 = vmatpush.msk.msrb.mxu1 %vm571_vm2, %v953_v62  ;;  %v857_v24 = vadd.f32 %v856_v34, %v2078_v47  ;;  %v895_v22 = vadd.f32 %v894_v56, %v2078_v47  ;;  %v848_v47 = vadd.f32 %v2159_v35, %v2094_v59 }
 0x1bb   :  { %v842_v35 = vadd.f32 %v2143_v19, %v2100_v27  ;;  %v880_v59 = vadd.f32 %v2145_v4, %v2100_v27  ;;  %v961_v27 = vpop.permute.xlu2 %960 }
 0x1bc   :  { %1081 = vmatpush.msrb.mxu0 %v944_v46  ;;  %1101 = vmatpush.msrb.mxu1 %v945_v2  ;;  %v946_v48 = vmax.f32 %v857_v24, 0.0  ;;  %v947_v41 = vmax.f32 %v895_v22, 0.0  ;;  %v922_v26 = vmax.f32 %v848_v47, 0.0  ;;  %v963_v4 = vperm.slane %v961_v27, 0 }
 0x1bd   :  { %v906_v30 = vmax.f32 %v842_v35, 0.0  ;;  %v907_v44 = vmax.f32 %v880_v59, 0.0 }
 0x1be   :  { %1082 = vmatpush.msrb.mxu0 %v936_v51  ;;  %1102 = vmatpush.msrb.mxu1 %v937_v0 }
 0x1c0   :  { %1083 = vmatpush.msrb.mxu0 %v928_v12  ;;  %1103 = vmatpush.msrb.mxu1 %v929_v54 }
 0x1c1   :  { %v859_v61 = vpop.f32.mrf.mxu2  ;;  %v897_v20 = vpop.f32.mrf.mxu3 }
 0x1c2   :  { %v860_v43 = vadd.f32 %v859_v61, %v2076_v1  ;;  %v898_v55 = vadd.f32 %v897_v20, %v2076_v1  ;;  %1084 = vmatpush.msrb.mxu0 %v920_v36  ;;  %1104 = vmatpush.msrb.mxu1 %v921_v37  ;;  %v851_v1 = vadd.f32 %v850_v49, %v2082_v7  ;;  %v938_v49 = vmax.f32 %v854_v21, 0.0 }
 0x1c3   :  { %v939_v7 = vmax.f32 %v892_v33, 0.0 }
 0x1c4   :  { %v954_v31 = vmax.f32 %v860_v43, 0.0  ;;  %v955_v29 = vmax.f32 %v898_v55, 0.0  ;;  %1085 = vmatpush.msrb.mxu0 %v912_v5  ;;  %1105 = vmatpush.msrb.mxu1 %v913_v40  ;;  %v930_v17 = vmax.f32 %v851_v1, 0.0 }
 0x1c6   :  { %1086 = vmatpush.msrb.mxu0 %v904_v25  ;;  %1106 = vmatpush.msrb.mxu1 %v905_v23 }
 0x1c7   :  { %1488 = vmatpush.msk.msrb.mxu2 %vm571_vm2, %v954_v31  ;;  %1490 = vmatpush.msk.msrb.mxu3 %vm571_vm2, %v955_v29 }
 0x1c8   :  { %1485 = vmatmul.msk.f32.vlgmr.msrb.gmra.mxu0 %vm549_vm3, %v2119_v58  ;;  %1487 = vmatmul.msk.f32.vlgmr.msrb.gmra.mxu1 %vm549_vm3, %v2119_v58 }
 0x1c9   :  { %1121 = vmatpush.msrb.mxu2 %v946_v48  ;;  %1141 = vmatpush.msrb.mxu3 %v947_v41 }
 0x1cb   :  { %1122 = vmatpush.msrb.mxu2 %v938_v49  ;;  %1142 = vmatpush.msrb.mxu3 %v939_v7 }
 0x1cd   :  { %1123 = vmatpush.msrb.mxu2 %v930_v17  ;;  %1143 = vmatpush.msrb.mxu3 %v931_v38 }
 0x1cf   :  { %1124 = vmatpush.msrb.mxu2 %v922_v26  ;;  %1144 = vmatpush.msrb.mxu3 %v923_v18 }
 0x1d1   :  { %1125 = vmatpush.msrb.mxu2 %v914_v15  ;;  %1145 = vmatpush.msrb.mxu3 %v915_v39 }
 0x1d3   :  { %1126 = vmatpush.msrb.mxu2 %v906_v30  ;;  %1146 = vmatpush.msrb.mxu3 %v907_v44 }
 0x1d4   :  { %1489 = vmatmul.msk.f32.vlgmr.msrb.gmra.mxu2 %vm549_vm3, %v2119_v58  ;;  %1491 = vmatmul.msk.f32.vlgmr.msrb.gmra.mxu3 %vm549_vm3, %v2119_v58 }
 0x20b   :  { %v1028_v19 = vpop.f32.mrf.mxu1  ;;  %v1008_v52 = vpop.f32.mrf.mxu0 }
 0x20c   :  { %v1029_v16 = vadd.f32 %v1028_v19, %v963_v4  ;;  %v1009_v32 = vadd.f32 %v1008_v52, %v963_v4 }
 0x20e   :  { %v1152_v63 = vsub.f32 0.0, %v1029_v16  ;;  %v1151_v56 = vsub.f32 0.0, %v1009_v32 }
 0x210   :  { %v1161_v34 = vmul.f32 1.442695, %v1152_v63  ;;  %v1159_v46 = vmul.f32 1.442695, %v1151_v56 }
 0x212   :  { %1497 = vpow2.f32 %v1161_v34 }
 0x213   :  { %1499 = vpow2.f32 %v1159_v46 }
 0x218   :  { %v1498_v58 = vpop.eup %1497 }
 0x219   :  { %v2213_v11 = vadd.f32 1.0, %v1498_v58  ;;  %v1500_v13 = vpop.eup %1499 }
 0x21a   :  { %v2216_v20 = vadd.f32 1.0, %v1500_v13 }
 0x21b   :  { %v1209_v39 = vand.u32 2147483648, %v2213_v11  ;;  %v1207_v44 = vand.u32 2147483647, %v2213_v11  ;;  %vm1203_vm6 = vweird.f32 %v2213_v11 }
 0x21c   :  { %vm1188_vm5 = vweird.f32 %v2216_v20  ;;  %v1192_v16 = vand.u32 2147483647, %v2216_v20  ;;  %v1194_v63 = vand.u32 2147483648, %v2216_v20 }
 0x21d   :  { %v1048_v53 = vpop.f32.mrf.mxu2  ;;  %v1068_v42 = vpop.f32.mrf.mxu3  ;;  %vm2272_vm9 = vcmp.eq.f32.partialorder %v1207_v44, 8.507059e+37 }
 0x21e   :  { %v1049_v28 = vadd.f32 %v1048_v53, %v963_v4  ;;  %v1069_v62 = vadd.f32 %v1068_v42, %v963_v4 }
 0x220   :  { %v1153_v57 = vsub.f32 0.0, %v1049_v28  ;;  %v1154_v50 = vsub.f32 0.0, %v1069_v62  ;;  %v1210_v28 = vor.u32 1.1754944e-38, %v1209_v39 }
 0x222   :  { %v1163_v2 = vmul.f32 1.442695, %v1153_v57  ;;  %v1165_v8 = vmul.f32 1.442695, %v1154_v50 }
 0x224   :  { %1501 = vpow2.f32 %v1163_v2 }
 0x225   :  { %1503 = vpow2.f32 %v1165_v8 }
 0x226   :  { %1505 = vrcp.f32 %v2213_v11 }
 0x22a   :  { %v1502_v14 = vpop.eup %1501 }
 0x22b   :  { %v1504_v61 = vpop.eup %1503  ;;  %v2218_v5 = vadd.f32 1.0, %v1502_v14 }
 0x22c   :  { %v2220_v40 = vadd.f32 1.0, %v1504_v61  ;;  %v2223_v43 = vpop.eup %1505 }
 0x22d   :  { %v1199_v23 = vmul.f32 %v2223_v43, %v2213_v11  ;;  %vm1204_vm4 = vweird.f32 %v2223_v43  ;;  %v1224_v8 = vand.u32 2147483648, %v2218_v5  ;;  %vm1218_vm12 = vweird.f32 %v2218_v5 }
 0x22e   :  { %vm2267_vm7 = vmor %vm1203_vm6, %vm1204_vm4  ;;  %vm1233_vm15 = vweird.f32 %v2220_v40  ;;  %v1239_v13 = vand.u32 2147483648, %v2220_v40 }
 0x22f   :  { %v1200_v47 = vsub.f32 1.0, %v1199_v23 }
 0x231   :  { %v1201_v59 = vmul.f32 %v2223_v43, %v1200_v47  ;;  %v1240_v47 = vor.u32 1.1754944e-38, %v1239_v13 }
 0x245   :  { %v1088_v3 = vpop.f32.mrf.mxu0  ;;  %v1108_v51 = vpop.f32.mrf.mxu1 }
 0x246   :  { %v1089_v0 = vadd.f32 %v1088_v3, %v963_v4  ;;  %v1109_v9 = vadd.f32 %v1108_v51, %v963_v4  ;;  %v1222_v3 = vand.u32 2147483647, %v2218_v5 }
 0x248   :  { %v1155_v12 = vsub.f32 0.0, %v1089_v0  ;;  %v1156_v54 = vsub.f32 0.0, %v1109_v9  ;;  %vm2327_vm3 = vcmp.eq.f32.partialorder %v1222_v3, 8.507059e+37 }
 0x24a   :  { %v1167_v36 = vmul.f32 1.442695, %v1155_v12  ;;  %v1169_v37 = vmul.f32 1.442695, %v1156_v54 }
 0x24c   :  { %1507 = vpow2.f32 %v1167_v36  ;;  %v2315_v36 = vor.u32 1.1754944e-38, %v1194_v63 }
 0x24d   :  { %1509 = vpow2.f32 %v1169_v37  ;;  %v1225_v37 = vor.u32 1.1754944e-38, %v1224_v8 }
 0x24e   :  { %1511 = vrcp.f32 %v2216_v20 }
 0x24f   :  { %1513 = vrcp.f32 %v2218_v5 }
 0x250   :  { %1515 = vrcp.f32 %v2220_v40 }
 0x252   :  { %v1508_v55 = vpop.eup %1507 }
 0x253   :  { %v1510_v24 = vpop.eup %1509  ;;  %v2227_v22 = vadd.f32 1.0, %v1508_v55  ;;  %v1237_v55 = vand.u32 2147483647, %v2220_v40 }
 0x254   :  { %v2229_v25 = vadd.f32 1.0, %v1510_v24  ;;  %v2233_v31 = vpop.eup %1511 }
 0x255   :  { %v2235_v29 = vpop.eup %1513  ;;  %1517 = vrcp.f32 %v2227_v22  ;;  %v1184_v41 = vmul.f32 %v2233_v31, %v2216_v20  ;;  %vm1189_vm8 = vweird.f32 %v2233_v31  ;;  %v1254_v24 = vand.u32 2147483648, %v2227_v22 }
 0x256   :  { %v2238_v1 = vpop.eup %1515  ;;  %1519 = vrcp.f32 %v2229_v25  ;;  %v1214_v7 = vmul.f32 %v2235_v29, %v2218_v5  ;;  %vm1219_vm10 = vweird.f32 %v2235_v29  ;;  %vm2300_vm13 = vmor %vm1188_vm5, %vm1189_vm8  ;;  %vm1248_vm6 = vweird.f32 %v2227_v22 }
 0x257   :  { %v1128_v21 = vpop.f32.mrf.mxu2  ;;  %v1148_v33 = vpop.f32.mrf.mxu3  ;;  %v1229_v10 = vmul.f32 %v2238_v1, %v2220_v40  ;;  %v1185_v35 = vsub.f32 1.0, %v1184_v41  ;;  %vm1234_vm11 = vweird.f32 %v2238_v1  ;;  %vm2308_vm14 = vmor %vm1218_vm12, %vm1219_vm10  ;;  %v1252_v40 = vand.u32 2147483647, %v2227_v22 }
 0x258   :  { %v1129_v45 = vadd.f32 %v1128_v21, %v963_v4  ;;  %v1149_v48 = vadd.f32 %v1148_v33, %v963_v4  ;;  %v1215_v18 = vsub.f32 1.0, %v1214_v7  ;;  %v1202_v4 = vadd.f32 %v2223_v43, %v1201_v59  ;;  %vm2319_vm1 = vmor %vm1233_vm15, %vm1234_vm11 }
 0x259   :  { %v1230_v15 = vsub.f32 1.0, %v1229_v10  ;;  %v1186_v27 = vmul.f32 %v2233_v31, %v1185_v35  ;;  %vm1320_vm8 = vcmask 1042434   ;;  %vm1263_vm10 = vweird.f32 %v2229_v25 }
 0x25a   :  { %v1157_v6 = vsub.f32 0.0, %v1129_v45  ;;  %v1158_v49 = vsub.f32 0.0, %v1149_v48  ;;  %v1216_v52 = vmul.f32 %v2235_v29, %v1215_v18  ;;  %v1206_v2 = vsel %vm2267_vm7, %v2223_v43, %v1202_v4 }
 0x25b   :  { %v2247_v38 = vpop.eup %1517  ;;  %v1231_v53 = vmul.f32 %v2238_v1, %v1230_v15  ;;  %v2279_v46 = vadd.f32 %v2233_v31, %v1186_v27  ;;  %v2306_v12 = vsel %vm2272_vm9, %v1210_v28, %v1206_v2  ;;  %v1269_v45 = vand.u32 2147483648, %v2229_v25 }
 0x25c   :  { %v1171_v60 = vmul.f32 1.442695, %v1157_v6  ;;  %v1173_v17 = vmul.f32 1.442695, %v1158_v49  ;;  %v2250_v26 = vpop.eup %1519  ;;  %v1244_v30 = vmul.f32 %v2247_v38, %v2227_v22  ;;  %v1217_v51 = vadd.f32 %v2235_v29, %v1216_v52 }
 0x25d   :  { %v1259_v19 = vmul.f32 %v2250_v26, %v2229_v25  ;;  %v1232_v0 = vadd.f32 %v2238_v1, %v1231_v53  ;;  %v1191_v5 = vsel %vm2300_vm13, %v2233_v31, %v2279_v46  ;;  %v1311_v33 = vrot.slane %v2306_v12, 7 }
 0x25e   :  { %1521 = vpow2.f32 %v1171_v60  ;;  %v1245_v62 = vsub.f32 1.0, %v1244_v30  ;;  %v1221_v23 = vsel %vm2308_vm14, %v2235_v29, %v1217_v51  ;;  %vm1249_vm4 = vweird.f32 %v2247_v38 }
 0x25f   :  { %1523 = vpow2.f32 %v1173_v17  ;;  %v1260_v57 = vsub.f32 1.0, %v1259_v19  ;;  %v1236_v21 = vsel %vm2319_vm1, %v2238_v1, %v1232_v0  ;;  %vm1264_vm5 = vweird.f32 %v2250_v26  ;;  %vm2353_vm9 = vmor %vm1248_vm6, %vm1249_vm4 }
 0x260   :  { %v1246_v9 = vmul.f32 %v2247_v38, %v1245_v62  ;;  %v1267_v6 = vand.u32 2147483647, %v2229_v25  ;;  %v1226_v7 = vsel %vm2327_vm3, %v1225_v37, %v1221_v23  ;;  %vm1238_vm7 = vcmp.eq.f32.partialorder %v1237_v55, 8.507059e+37  ;;  %vm2359_vm11 = vmor %vm1263_vm10, %vm1264_vm5 }
 0x261   :  { %v1261_v14 = vmul.f32 %v2250_v26, %v1260_v57  ;;  %v1255_v60 = vor.u32 1.1754944e-38, %v1254_v24  ;;  %v1241_v35 = vsel %vm1238_vm7, %v1240_v47, %v1236_v21  ;;  %v1270_v59 = vor.u32 1.1754944e-38, %v1269_v45 }
 0x262   :  { %v1247_v48 = vadd.f32 %v2247_v38, %v1246_v9  ;;  %vm1253_vm12 = vcmp.eq.f32.partialorder %v1252_v40, 8.507059e+37  ;;  %vm1318_vm14 = vcmask 1040384   ;;  %vm1268_vm15 = vcmp.eq.f32.partialorder %v1267_v6, 8.507059e+37 }
 0x263   :  { %v1262_v29 = vadd.f32 %v2250_v26, %v1261_v14  ;;  %v1313_v28 = vrot.slane %v1241_v35, 5 }
 0x264   :  { %v1522_v42 = vpop.eup %1521  ;;  %v1251_v15 = vsel %vm2353_vm9, %v2247_v38, %v1247_v48 }
 0x265   :  { %v1524_v56 = vpop.eup %1523  ;;  %v2276_v50 = vadd.f32 1.0, %v1522_v42  ;;  %v1266_v25 = vsel %vm2359_vm11, %v2250_v26, %v1262_v29  ;;  %v1256_v52 = vsel %vm1253_vm12, %v1255_v60, %v1251_v15  ;;  %v1312_v42 = vrot.slane %v1226_v7, 6 }
 0x266   :  { %v2286_v58 = vadd.f32 1.0, %v1524_v56  ;;  %v1271_v53 = vsel %vm1268_vm15, %v1270_v59, %v1266_v25  ;;  %v1314_v56 = vrot.slane %v1256_v52, 4  ;;  %vm1323_vm11 = vcmask 1044484  }
 0x267   :  { %1525 = vrcp.f32 %v2276_v50  ;;  %v1284_v39 = vand.u32 2147483648, %v2276_v50  ;;  %v1282_v19 = vand.u32 2147483647, %v2276_v50  ;;  %vm1278_vm4 = vweird.f32 %v2276_v50 }
 0x268   :  { %1527 = vrcp.f32 %v2286_v58  ;;  %v1299_v27 = vand.u32 2147483648, %v2286_v58  ;;  %v1297_v38 = vand.u32 2147483647, %v2286_v58  ;;  %vm1293_vm6 = vweird.f32 %v2286_v58 }
 0x269   :  { %v1285_v32 = vor.u32 1.1754944e-38, %v1284_v39  ;;  %vm1283_vm9 = vcmp.eq.f32.partialorder %v1282_v19, 8.507059e+37  ;;  %v1315_v8 = vrot.slane %v1271_v53, 3  ;;  %vm1325_vm12 = vcmask 1046534  }
 0x26a   :  { %v1300_v62 = vor.u32 1.1754944e-38, %v1299_v27  ;;  %vm1298_vm10 = vcmp.eq.f32.partialorder %v1297_v38, 8.507059e+37  ;;  %vm1193_vm15 = vcmp.eq.f32.partialorder %v1192_v16, 8.507059e+37 }
 0x26b   :  { %v1196_v0 = vsel %vm1193_vm15, %v2315_v36, %v1191_v5  ;;  %v1324_v16 = vsel %vm1323_vm11, %v1314_v56, %v1315_v8 }
 0x26c   :  { %v1319_v20 = vsel %vm1318_vm14, %v1196_v0, %v1311_v33 }
 0x26d   :  { %v1526_v41 = vpop.eup %1525 }
 0x26e   :  { %v1528_v49 = vpop.eup %1527  ;;  %v1274_v1 = vmul.f32 %v1526_v41, %v2276_v50  ;;  %vm1279_vm1 = vweird.f32 %v1526_v41 }
 0x26f   :  { %v1289_v17 = vmul.f32 %v1528_v49, %v2286_v58  ;;  %vm1294_vm3 = vweird.f32 %v1528_v49  ;;  %vm1280_vm5 = vmor %vm1278_vm4, %vm1279_vm1  ;;  %v1321_v58 = vsel %vm1320_vm8, %v1312_v42, %v1313_v28  ;;  %vm1327_vm1 = vcmask 1045508  }
 0x270   :  { %v1275_v18 = vsub.f32 1.0, %v1274_v1  ;;  %vm1295_vm7 = vmor %vm1293_vm6, %vm1294_vm3  ;;  %v1322_v54 = vsel %vm571_vm2, %v1319_v20, %v1321_v58 }
 0x271   :  { %v1290_v30 = vsub.f32 1.0, %v1289_v17 }
 0x272   :  { %v1276_v44 = vmul.f32 %v1526_v41, %v1275_v18 }
 0x273   :  { %v1291_v4 = vmul.f32 %v1528_v49, %v1290_v30 }
 0x274   :  { %v1277_v63 = vadd.f32 %v1526_v41, %v1276_v44 }
 0x275   :  { %v1292_v26 = vadd.f32 %v1528_v49, %v1291_v4 }
 0x276   :  { %v1281_v34 = vsel %vm1280_vm5, %v1526_v41, %v1277_v63 }
 0x277   :  { %v1286_v57 = vsel %vm1283_vm9, %v1285_v32, %v1281_v34  ;;  %v1296_v2 = vsel %vm1295_vm7, %v1528_v49, %v1292_v26 }
 0x278   :  { %v1301_v3 = vsel %vm1298_vm10, %v1300_v62, %v1296_v2  ;;  %v1316_v50 = vrot.slane %v1286_v57, 2 }
 0x279   :  { %v1317_v51 = vrot.slane %v1301_v3, 1 }
 0x27b   :  { %v1326_v9 = vsel %vm1325_vm12, %v1316_v50, %v1317_v51 }
 0x27c   :  { %v1328_v13 = vsel %vm1327_vm1, %v1324_v16, %v1326_v9 }
 0x27d   :  { %v1329_v14 = vsel %vm123_vm0, %v1322_v54, %v1328_v13 }
 0x27e   :  { %1331 = vst [vmem:[#allocation3] sm:$0xff] %v1329_v14 }
 0x27f   :  { %1342 = dma.vmem_to_hbm [thread:$0]  %s1338_s13, 128, %s1340_s16, [#allocation4]  }
 0x280   :  { %1553 = dma.done.wait [#allocation4], 128  }
 0x281   :  { %1554 = vsyncadd [#allocation4], 4294967168 }
 0x282   :  { %1347 = vsyncpa [#allocation4], 1 }

</bundles_post_ra>
